<compile_context>
chip_gen: v7x
topology: tpu7x:2x2x1
jax: 0.10.0
libtpu: 0.0.40
codegen_flags: <defaults>
</compile_context>

<pallas_src>
import functools
import math

import jax
import jax.numpy as jnp
from jax import lax
from jax.experimental import pallas as pl
from jax.experimental.pallas import tpu as pltpu


_NSLOT = 32                                  # in-flight row DMAs (rotating window)
_SUB = 8                                     # sublane slab for the resident path
_OUT_TILE_BYTES_BUDGET = 12 * 1024 * 1024    # per output buffer (x2 double-buffered)
_RESIDENT_VMEM_BUDGET = 40 * 1024 * 1024     # table(x2 bufs) + out tiles must fit here
_VMEM_LIMIT_CAP = 48 * 1024 * 1024           # stay well under v7x's 64 MiB / TC


def _embedding_gather_kernel(ids_ref, table_ref, out_ref, sem_ref, *,
                             scale, token_tile):
    # ids_ref:   (N_pad,)        int32  SMEM (scalar-prefetched token ids)
    # table_ref: (V, E)                 HBM  (memory_space=pl.ANY, no auto-DMA)
    # out_ref:   (token_tile, E)        VMEM output tile (rows DMA'd directly here)
    # sem_ref:   (_NSLOT,)              DMA semaphores (scratch)
    base = pl.program_id(0) * token_tile

    def start(row, j, slot):
        pltpu.make_async_copy(
            table_ref.at[pl.ds(row, 1), :],
            out_ref.at[pl.ds(j, 1), :],
            sem_ref.at[slot],
        ).start()

    def wait(j, slot):
        # Only the semaphore + transfer size matter for wait(); src row is dontcare.
        pltpu.make_async_copy(
            table_ref.at[pl.ds(0, 1), :],
            out_ref.at[pl.ds(j, 1), :],
            sem_ref.at[slot],
        ).wait()

    # Prologue: fill the in-flight window (static slots).
    for s in range(_NSLOT):
        start(ids_ref[base + s], s, s)

    n_chunks = token_tile // _NSLOT

    # Steady state: wait chunk c's rows and reuse each slot for the matching row
    # of chunk c+1.  The slot loop is a static Python loop (unroll by _NSLOT) so
    # slot indices / modulo are static; the next token id is read from SMEM
    # *before* the wait.
    def chunk_body(c, carry):
        off = pl.multiple_of(c * _NSLOT, _NSLOT)
        for s in range(_NSLOT):
            j = off + s
            nj = j + _NSLOT
            next_row = ids_ref[base + nj]      # SMEM read BEFORE .wait()
            wait(j, s)
            start(next_row, nj, s)
        return carry

    lax.fori_loop(0, n_chunks - 1, chunk_body, 0)

    # Epilogue: drain the final chunk (static row indices), then scale in place.
    last = (n_chunks - 1) * _NSLOT
    for s in range(_NSLOT):
        wait(last + s, s)

    out_ref[...] = (out_ref[...] * scale).astype(out_ref.dtype)


def _embedding_resident_kernel(ids_ref, table_ref, out_ref, *, scale, token_tile):
    # ids_ref:   (N_pad,)        int32  SMEM (scalar-prefetched token ids)
    # table_ref: (V, E)                 VMEM (whole table, constant block -> fetched once)
    # out_ref:   (token_tile, E)        VMEM output tile
    base = pl.program_id(0) * token_tile

    def slab(c, carry):
        off = pl.multiple_of(c * _SUB, _SUB)
        rows = [table_ref[pl.ds(ids_ref[base + off + k], 1), :]
                for k in range(_SUB)]
        out_ref[pl.ds(off, _SUB), :] = (
            jnp.concatenate(rows, axis=0) * scale).astype(out_ref.dtype)
        return carry

    lax.fori_loop(0, token_tile // _SUB, slab, 0)


def _pick_tile(n, row_bytes, token_tile):
    # Largest tile such that one (tile, E) output buffer stays within budget,
    # rounded to a multiple of _NSLOT; shrink for tiny inputs; never below _NSLOT.
    max_by_vmem = max(_NSLOT, (_OUT_TILE_BYTES_BUDGET // row_bytes) // _NSLOT * _NSLOT)
    tile = max(_NSLOT, int(token_tile) // _NSLOT * _NSLOT)
    tile = min(tile, max_by_vmem)
    tile = min(tile, pl.cdiv(n, _NSLOT) * _NSLOT)   # don't over-pad tiny inputs
    return max(tile, _NSLOT)


def embeddings_forward(token_ids, emb_table, *, token_tile=256,
                       force_hbm_gather=False):
    """Pallas equivalent of Embeddings.forward.

    token_ids: (...,) integer token ids
    emb_table: (V, E) embedding table
    returns:   (..., E)  ==  emb_table[token_ids] * sqrt(E)
    """
    lead_shape = token_ids.shape
    v, e = emb_table.shape
    n = 1
    for d in lead_shape:
        n *= int(d)
    scale = float(math.sqrt(e))
    itemsize = jnp.dtype(emb_table.dtype).itemsize

    tile = _pick_tile(n, e * itemsize, token_tile)

    ids_flat = token_ids.reshape(n).astype(jnp.int32)
    n_pad = pl.cdiv(n, tile) * tile
    if n_pad != n:
        # Padded slots gather row 0 and are trimmed after the call.
        ids_flat = jnp.pad(ids_flat, (0, n_pad - n))

    grid = (n_pad // tile,)
    tile_bytes = tile * e * itemsize
    table_bytes = v * e * itemsize

    resident = (not force_hbm_gather) and (
        2 * table_bytes + 2 * tile_bytes + (2 << 20) <= _RESIDENT_VMEM_BUDGET)

    if resident:
        kernel = functools.partial(_embedding_resident_kernel,
                                   scale=scale, token_tile=tile)
        table_spec = pl.BlockSpec((v, e), lambda i, ids: (0, 0))  # whole table, resident
        scratch = []
        vmem_limit = min(_VMEM_LIMIT_CAP,
                         2 * table_bytes + 2 * tile_bytes + (4 << 20))
    else:
        kernel = functools.partial(_embedding_gather_kernel,
                                   scale=scale, token_tile=tile)
        table_spec = pl.BlockSpec(memory_space=pl.ANY)            # table stays in HBM
        scratch = [pltpu.SemaphoreType.DMA((_NSLOT,))]
        vmem_limit = min(_VMEM_LIMIT_CAP, max(4 << 20, 3 * tile_bytes))

    out_flat = pl.pallas_call(
        kernel,
        out_shape=jax.ShapeDtypeStruct((n_pad, e), emb_table.dtype),
        grid_spec=pltpu.PrefetchScalarGridSpec(
            num_scalar_prefetch=1,                       # ids -> SMEM
            grid=grid,
            in_specs=[table_spec],
            out_specs=pl.BlockSpec((tile, e), lambda i, ids: (i, 0)),
            scratch_shapes=scratch,
        ),
        compiler_params=pltpu.CompilerParams(
            dimension_semantics=("parallel",),
            vmem_limit_bytes=int(vmem_limit),
        ),
    )(ids_flat, emb_table)

    return out_flat[:n].reshape(*lead_shape, e)


if __name__ == "__main__":
    key = jax.random.PRNGKey(0)
    k_tab, k_a, k_b = jax.random.split(key, 3)

    vocab_size, emb_dims = 64, 32
    # nn.Embedding default init is N(0, 1); reproduce deterministically.
    emb_table = jax.random.normal(k_tab, (vocab_size, emb_dims), dtype=jnp.float32)

    def reference(ids, table):
        return table[ids] * jnp.float32(math.sqrt(table.shape[1]))

    cases = [((2, 8), k_a),      # single-chunk tile, grid = 1
             ((4, 96), k_b)]     # multi-chunk steady-state loop, grid = 2, padding

    for (bb, ss), k in cases:
        token_ids = jax.random.randint(k, (bb, ss), 0, vocab_size, dtype=jnp.int32)
        ref = reference(token_ids, emb_table)
        for force in (False, True):   # False -> VMEM-resident path, True -> HBM row-DMA gather
            out = embeddings_forward(token_ids, emb_table, force_hbm_gather=force)
            out = jax.block_until_ready(out)
            assert out.shape == (bb, ss, emb_dims), out.shape
            assert out.dtype == emb_table.dtype, out.dtype
            assert jnp.allclose(out, ref, atol=1e-5, rtol=1e-5), \
                f"mismatch vs reference (shape={(bb, ss)}, force_hbm_gather={force})"

    print("KERNEL_OK")
</pallas_src>

<mosaic_0001>
module attributes {stable_mosaic.version = 11 : i64} {
  func.func @_embedding_resident_kernel(%arg0: i32, %arg1: memref<32xi32, #tpu.memory_space<smem>>, %arg2: memref<64x32xf32, #tpu.memory_space<vmem>>, %arg3: memref<32x32xf32, #tpu.memory_space<vmem>>) attributes {dimension_semantics = [#tpu.dimension_semantics<parallel>], iteration_bounds = array<i64: 1>, scalar_prefetch = 1 : i64, scratch_operands = 0 : i64, tpu.core_type = #tpu.core_type<tc>, window_params = [{pipeline_mode = #tpu.pipeline_mode<synchronous>, transform_indices = @transform_0, window_bounds = array<i64: 64, 32>}, {transform_indices = @transform_1, window_bounds = array<i64: 32, 32>}]} {
    %c32_i32 = arith.constant 32 : i32
    %0 = arith.muli %arg0, %c32_i32 : i32
    %c0_i32 = arith.constant 0 : i32
    %c4_i32 = arith.constant 4 : i32
    %1 = arith.addi %c0_i32, %c4_i32 : i32
    %c1_i32 = arith.constant 1 : i32
    scf.for %arg4 = %c0_i32 to %1 step %c1_i32  : i32 {
      %c8_i32 = arith.constant 8 : i32
      %2 = arith.muli %arg4, %c8_i32 : i32
      %3 = tpu.assume_multiple %2, 8 : i32
      %4 = arith.addi %0, %3 : i32
      %c0_i32_1 = arith.constant 0 : i32
      %5 = arith.addi %4, %c0_i32_1 : i32
      %6 = arith.index_cast %5 : i32 to index
      %7 = memref.load %arg1[%6] : memref<32xi32, #tpu.memory_space<smem>>
      %8 = arith.index_cast %7 : i32 to index
      %c0 = arith.constant 0 : index
      %9 = vector.load %arg2[%8, %c0] : memref<64x32xf32, #tpu.memory_space<vmem>>, vector<1x32xf32>
      %10 = arith.addi %0, %3 : i32
      %c1_i32_2 = arith.constant 1 : i32
      %11 = arith.addi %10, %c1_i32_2 : i32
      %12 = arith.index_cast %11 : i32 to index
      %13 = memref.load %arg1[%12] : memref<32xi32, #tpu.memory_space<smem>>
      %14 = arith.index_cast %13 : i32 to index
      %c0_3 = arith.constant 0 : index
      %15 = vector.load %arg2[%14, %c0_3] : memref<64x32xf32, #tpu.memory_space<vmem>>, vector<1x32xf32>
      %16 = arith.addi %0, %3 : i32
      %c2_i32 = arith.constant 2 : i32
      %17 = arith.addi %16, %c2_i32 : i32
      %18 = arith.index_cast %17 : i32 to index
      %19 = memref.load %arg1[%18] : memref<32xi32, #tpu.memory_space<smem>>
      %20 = arith.index_cast %19 : i32 to index
      %c0_4 = arith.constant 0 : index
      %21 = vector.load %arg2[%20, %c0_4] : memref<64x32xf32, #tpu.memory_space<vmem>>, vector<1x32xf32>
      %22 = arith.addi %0, %3 : i32
      %c3_i32 = arith.constant 3 : i32
      %23 = arith.addi %22, %c3_i32 : i32
      %24 = arith.index_cast %23 : i32 to index
      %25 = memref.load %arg1[%24] : memref<32xi32, #tpu.memory_space<smem>>
      %26 = arith.index_cast %25 : i32 to index
      %c0_5 = arith.constant 0 : index
      %27 = vector.load %arg2[%26, %c0_5] : memref<64x32xf32, #tpu.memory_space<vmem>>, vector<1x32xf32>
      %28 = arith.addi %0, %3 : i32
      %c4_i32_6 = arith.constant 4 : i32
      %29 = arith.addi %28, %c4_i32_6 : i32
      %30 = arith.index_cast %29 : i32 to index
      %31 = memref.load %arg1[%30] : memref<32xi32, #tpu.memory_space<smem>>
      %32 = arith.index_cast %31 : i32 to index
      %c0_7 = arith.constant 0 : index
      %33 = vector.load %arg2[%32, %c0_7] : memref<64x32xf32, #tpu.memory_space<vmem>>, vector<1x32xf32>
      %34 = arith.addi %0, %3 : i32
      %c5_i32 = arith.constant 5 : i32
      %35 = arith.addi %34, %c5_i32 : i32
      %36 = arith.index_cast %35 : i32 to index
      %37 = memref.load %arg1[%36] : memref<32xi32, #tpu.memory_space<smem>>
      %38 = arith.index_cast %37 : i32 to index
      %c0_8 = arith.constant 0 : index
      %39 = vector.load %arg2[%38, %c0_8] : memref<64x32xf32, #tpu.memory_space<vmem>>, vector<1x32xf32>
      %40 = arith.addi %0, %3 : i32
      %c6_i32 = arith.constant 6 : i32
      %41 = arith.addi %40, %c6_i32 : i32
      %42 = arith.index_cast %41 : i32 to index
      %43 = memref.load %arg1[%42] : memref<32xi32, #tpu.memory_space<smem>>
      %44 = arith.index_cast %43 : i32 to index
      %c0_9 = arith.constant 0 : index
      %45 = vector.load %arg2[%44, %c0_9] : memref<64x32xf32, #tpu.memory_space<vmem>>, vector<1x32xf32>
      %46 = arith.addi %0, %3 : i32
      %c7_i32 = arith.constant 7 : i32
      %47 = arith.addi %46, %c7_i32 : i32
      %48 = arith.index_cast %47 : i32 to index
      %49 = memref.load %arg1[%48] : memref<32xi32, #tpu.memory_space<smem>>
      %50 = arith.index_cast %49 : i32 to index
      %c0_10 = arith.constant 0 : index
      %51 = vector.load %arg2[%50, %c0_10] : memref<64x32xf32, #tpu.memory_space<vmem>>, vector<1x32xf32>
      %52 = tpu.concatenate %9, %15, %21, %27, %33, %39, %45, %51 in 0 : vector<1x32xf32>, vector<1x32xf32>, vector<1x32xf32>, vector<1x32xf32>, vector<1x32xf32>, vector<1x32xf32>, vector<1x32xf32>, vector<1x32xf32> -> vector<8x32xf32>
      %cst = arith.constant 5.65685415 : f32
      %53 = vector.broadcast %cst : f32 to vector<8x32xf32>
      %54 = arith.mulf %52, %53 : vector<8x32xf32>
      %55 = arith.index_cast %3 : i32 to index
      %c0_11 = arith.constant 0 : index
      %56 = vector.load %arg3[%55, %c0_11] : memref<32x32xf32, #tpu.memory_space<vmem>>, vector<8x32xf32>
      tpu.vector_store %arg3[%55, %c0_11], %54 {strides = array<i32>} : memref<32x32xf32, #tpu.memory_space<vmem>>, vector<8x32xf32>,
    }
    %c4_i32_0 = arith.constant 4 : i32
    return
  }
  func.func @transform_0(%arg0: i32, %arg1: memref<32xi32, #tpu.memory_space<smem>>) -> (i32, i32) {
    %c0_i32 = arith.constant 0 : i32
    %c0_i32_0 = arith.constant 0 : i32
    %c0_i32_1 = arith.constant 0 : i32
    return %c0_i32, %c0_i32_0 : i32, i32
  }
  func.func @transform_1(%arg0: i32, %arg1: memref<32xi32, #tpu.memory_space<smem>>) -> (i32, i32) {
    %c0_i32 = arith.constant 0 : i32
    %c0_i32_0 = arith.constant 0 : i32
    return %arg0, %c0_i32 : i32, i32
  }
}

</mosaic_0001>

<bundles_post_ra>
// kernel: tpu_custom_call.1
= control target key start
LH: loop header
LB: loop body
LE: loop exit
PB: predicated region body
PF: predicated region fallthrough
CT: control target
= control target key end

     0   :  { %s263_s0 = inlined_call_operand.vmem [shape: s32[32], index: 0, kind: input, shape index: {}]   ;;  %s264_s1 = inlined_call_operand.vmem [shape: f32[64,32], index: 1, kind: input, shape index: {}]   ;;  %s265_s2 = inlined_call_operand.hbm [shape: f32[32,32], index: 2, kind: output, shape index: {}]  }
   0x1   :  { %s7_s11 = sshll.u32 %s263_s0, 4  ;;  %s8_s11 = int_to_ptr.vmem [resolvable:$true] %s7_s11 }
   0x2   :  { %s139_s12 = scalar_lea.vmem %s8_s11, 16  ;;  %p144_p1 = scmp.lt.s32.totalorder %s8_s11, %s8_s11 }
   0x3   :  { %p140_p0 = scmp.ne.s32.totalorder %s8_s11, %s139_s12  ;;  %p145_p2 = scmp.lt.s32.totalorder %s139_s12, %s139_s12 }
   0x5   :  { %p146_p3 = por %p145_p2, %p144_p1 }
   0x7   :  { %p147_p4 = pnand %p146_p3, %p140_p0 }
   0x9   :  { %150 = shalt.err (!%p147_p4)  }
   0xa   :  { %s185_s13 = smov [#allocation3]  }
   0xb   :  { %10 = dma.vmem_to_smem %s8_s11, 16, %s185_s13, [#allocation2] }
   0xc   :  { %177 = dma.done.wait [#allocation2], 16 }
   0xd   :  { %178 = vsyncadd [#allocation2], 4294967280 }
   0xe   :  { %12 = sfence }
   0xf   :  { %13 = vsyncpa [#allocation5], 0  ;;  %s207_s14 = smov 0  }
  0x10 LB: > { %s213_s0 = sshll.u32 %s183_s14, 3  ;;  %vm77_vm0 = vcmask 1040384   ;;  %vm79_vm1 = vcmask 1041408   ;;  %vm81_vm2 = vcmask 1042432   ;;  %vm83_vm3 = vcmask 1043456   ;;  %s22_s14 = sadd.s32 1, %s183_s14   ;;  %s183_s14 = sphi %s207_s14, %s22_s14  }
  0x11   : > { %s25_s15 = sld [smem:[#allocation3 + %s213_s0]]  ;;  %s28_s16 = sadd.s32 1, %s213_s0  ;;  %vm85_vm4 = vcmask 1044480   ;;  %vm87_vm5 = vcmask 1045504   ;;  %vm89_vm6 = vcmask 1046528   ;;  %vm93_vm7 = vcmask 261120  }
  0x12   : > { %s29_s17 = sld [smem:[#allocation3 + %s28_s16]]  ;;  %s32_s18 = sadd.s32 2, %s213_s0 }
  0x13   : > { %s33_s19 = sld [smem:[#allocation3 + %s32_s18]]  ;;  %s36_s20 = sadd.s32 3, %s213_s0 }
  0x14   : > { %s37_s21 = sld [smem:[#allocation3 + %s36_s20]]  ;;  %s40_s22 = sadd.s32 4, %s213_s0 }
  0x15   : > { %s41_s23 = sld [smem:[#allocation3 + %s40_s22]]  ;;  %s44_s24 = sadd.s32 5, %s213_s0 }
  0x16   : > { %s45_s25 = sld [smem:[#allocation3 + %s44_s24]]  ;;  %s48_s26 = sadd.s32 6, %s213_s0 }
  0x17   : > { %s26_s29 = scalar_lea.vmem %s264_s1, %s25_s15  ;;  %s49_s30 = sld [smem:[#allocation3 + %s48_s26]] }
  0x18   : > { %s30_s5 = scalar_lea.vmem %s264_s1, %s29_s17  ;;  %s52_s6 = sadd.s32 7, %s213_s0  ;;  %v27_v0 = vld [vmem:[%s26_s29] sm:$0x1] }
  0x19   : > { %v31_v1 = vld [vmem:[%s30_s5] sm:$0x1]  ;;  %s34_s9 = scalar_lea.vmem %s264_s1, %s33_s19  ;;  %s53_s10 = sld [smem:[#allocation3 + %s52_s6]] }
  0x1a   : > { %v35_v2 = vld [vmem:[%s34_s9] sm:$0x1]  ;;  %s38_s13 = scalar_lea.vmem %s264_s1, %s37_s21  ;;  %v57_v3 = vrot.slane %v31_v1, 7  ;;  %s92_s27 = scalar_lea.vmem [#allocation4], %s213_s0 }
  0x1b   : > { %v39_v4 = vld [vmem:[%s38_s13] sm:$0x1]  ;;  %s42_s17 = scalar_lea.vmem %s264_s1, %s41_s23  ;;  %v60_v5 = vrot.slane %v35_v2, 6  ;;  %p19_p5 = scmp.ge.s32.totalorder %s22_s14, 4  }
  0x1c   : > { %v43_v6 = vld [vmem:[%s42_s17] sm:$0x1]  ;;  %s46_s19 = scalar_lea.vmem %s264_s1, %s45_s25  ;;  %v63_v7 = vrot.slane %v39_v4, 5  ;;  %v78_v8 = vsel %vm77_vm0, %v27_v0, %v57_v3  ;;  %s186_s28 = smov (%p19_p5), [#allocation4]  }
  0x1d   : > { %v47_v9 = vld [vmem:[%s46_s19] sm:$0x1]  ;;  %s50_s24 = scalar_lea.vmem %s264_s1, %s49_s30  ;;  %v66_v10 = vrot.slane %v43_v6, 4  ;;  %v80_v11 = vsel %vm79_vm1, %v78_v8, %v60_v5  ;;  %s100_s29 = sshll.u32 (%p19_p5), %s186_s28, 4  ;;  %s101_s29 = int_to_ptr.vmem [resolvable:$true] %s100_s29 }
  0x1e   : > { %v51_v12 = vld [vmem:[%s50_s24] sm:$0x1]  ;;  %v69_v13 = vrot.slane %v47_v9, 3  ;;  %v82_v14 = vsel %vm81_vm2, %v80_v11, %v63_v7  ;;  %s151_s30 = scalar_lea.vmem (%p19_p5), %s101_s29, 512  ;;  %p156_p7 = scmp.lt.s32.totalorder (%p19_p5), %s101_s29, %s101_s29 }
  0x1f   : > { %s54_s25 = scalar_lea.vmem %s264_s1, %s53_s10  ;;  %v72_v15 = vrot.slane %v51_v12, 2  ;;  %v84_v16 = vsel %vm83_vm3, %v82_v14, %v66_v10  ;;  %p152_p6 = scmp.ne.s32.totalorder (%p19_p5), %s101_s29, %s151_s30 }
  0x20   : > { %v55_v17 = vld [vmem:[%s54_s25] sm:$0x1]  ;;  %v86_v18 = vsel %vm85_vm4, %v84_v16, %v69_v13  ;;  %21 = sbr.rel (!%p19_p5) target bundleno = 16 (0x10), region = 40  ;;  %p157_p8 = scmp.lt.s32.totalorder (%p19_p5), %s151_s30, %s151_s30 }
  0x21   : > { %v75_v19 = vrot.slane %v55_v17, 1  ;;  %v88_v20 = vsel %vm87_vm5, %v86_v18, %v72_v15 }
  0x22   :  { %p158_p9 = por (%p19_p5), %p157_p8, %p156_p7 }
  0x23   : > { %v90_v21 = vsel %vm89_vm6, %v88_v20, %v75_v19 }
  0x24   : > { %v91_v22 = vmul.f32 5.656854, %v90_v21  ;;  %p159_p10 = pnand (%p19_p5), %p158_p9, %p152_p6 }
  0x26   : > { %94 = vst.msk [vmem:[%s92_s27] sm:$0xff] %vm93_vm7, %v91_v22 }
  0x27   :  { %162 = shalt.err (!%p159_p10)
}
  0x28   :  { %s163_s0 = scalar_lea.hbm %s265_s2, 512 }
  0x29   :  { %p164_p11 = scmp.ne.s32.totalorder %s265_s2, %s163_s0  ;;  %p167_p12 = scmp.lt.u32.totalorder %s163_s0, %s265_s2 }
  0x2b   :  { %p169_p13 = pnand %p167_p12, %p164_p11 }
  0x2d   :  { %172 = shalt.err (!%p169_p13)
}
  0x2e   :  { %s187_s1 = smov 128   ;;  %s188_s8 = smov 8  }
  0x2f   :  { %106 = dma.vmem_to_hbm [thread:$0]  %s101_s29, 512, %s265_s2, [#allocation5], %s187_s1, %s187_s1, %s188_s8  }
  0x30   :  { %179 = dma.done.wait [#allocation5], 512  }
  0x31   :  { %180 = vsyncadd [#allocation5], 4294966784 }
  0x32   :  { %110 = vsyncpa [#allocation5], 1 }

</bundles_post_ra>
